<compile_context>
chip_gen: v7x
topology: tpu7x:2x2x1
jax: 0.10.0
libtpu: 0.0.40
codegen_flags: <defaults>
</compile_context>

<pallas_src>
import jax
import jax.numpy as jnp
from jax import lax
from jax.experimental import pallas as pl
from jax.experimental.pallas import tpu as pltpu

NEG_SLOPE = 0.02
B = 2          # batch for the demo
SW = 8         # signal_window_size (conv depth)
H = W = 8      # BES 8x8 spatial grid
C1, C2 = 4, 8  # num_channels
FC1, FC2 = 40, 20
IN_FEAT = SW * H * W          # 512 lanes: (h, w, d)
CONV1_FEAT = 6 * 6 * C1       # 144 lanes: (i, j, co)
CONV2_FEAT = 4 * 4 * C2       # 128 lanes: (i', j', co)  == fc1 input features
OUT_PAD = 128                 # lane-dense output slab


def _leaky(v):
    return jnp.where(v >= 0, v, NEG_SLOPE * v)


def cnn_kernel(x_ref, w1_ref, b1_ref, w2_ref, b2_ref,
               wf1_ref, bf1_ref, wf2_ref, bf2_ref, wf3_ref, bf3_ref,
               o_ref):
    """One batch tile per grid step.

    x_ref  : (TB, 512)  rows = samples, lanes = (h, w, d)
    w1_ref : (512, 144) conv1 as block-Toeplitz matmul weight, cols = (i, j, co)
    w2_ref : (144, 128) conv2 as block-Toeplitz matmul weight, cols = (i', j', co)
    wf1_ref: (128, 40)  fc1 weight (rows permuted to (i', j', co) order)
    wf3_ref: (20, 128)  fc3 weight zero-padded to 128 output lanes (col 0 is the real output)
    o_ref  : (TB, 128)
    """
    x = x_ref[...]
    h = _leaky(jnp.dot(x, w1_ref[...], preferred_element_type=jnp.float32) + b1_ref[...])
    h = _leaky(jnp.dot(h, w2_ref[...], preferred_element_type=jnp.float32) + b2_ref[...])
    h = _leaky(jnp.dot(h, wf1_ref[...], preferred_element_type=jnp.float32) + bf1_ref[...])
    h = _leaky(jnp.dot(h, wf2_ref[...], preferred_element_type=jnp.float32) + bf2_ref[...])
    o_ref[...] = jnp.dot(h, wf3_ref[...], preferred_element_type=jnp.float32) + bf3_ref[...]


def cnn_forward_pallas(x_ncdhw, kparams, tile_b=256):
    """x_ncdhw: (B, 1, D, H, W) float32 (PyTorch layout). Returns (B, 1)."""
    batch = x_ncdhw.shape[0]
    # layout plumbing: NCDHW -> rows = sample, lanes = (h, w, d)
    x2d = jnp.transpose(x_ncdhw[:, 0], (0, 2, 3, 1)).reshape(batch, IN_FEAT)

    if batch > tile_b:
        tile = tile_b                                  # multiple of 8
        b_pad = pl.cdiv(batch, tile) * tile
        x2d = jnp.pad(x2d, ((0, b_pad - batch), (0, 0)))
    else:
        tile = batch
        b_pad = batch
    grid = (b_pad // tile,)

    weights = list(kparams)
    in_specs = [pl.BlockSpec((tile, IN_FEAT), lambda t: (t, 0))]
    in_specs += [pl.BlockSpec(w.shape, lambda t: (0, 0)) for w in weights]

    out = pl.pallas_call(
        cnn_kernel,
        out_shape=jax.ShapeDtypeStruct((b_pad, OUT_PAD), jnp.float32),
        grid=grid,
        in_specs=in_specs,
        out_specs=pl.BlockSpec((tile, OUT_PAD), lambda t: (t, 0)),
        compiler_params=pltpu.CompilerParams(dimension_semantics=("parallel",)),
    )(x2d, *weights)
    return out[:batch, :1]


# ---------------- parameter init (deterministic, PyTorch-native layouts) ----------------
def init_params(key):
    ks = jax.random.split(key, 10)

    def u(k, shape, fan_in):
        bound = 1.0 / jnp.sqrt(jnp.float32(fan_in))
        return jax.random.uniform(k, shape, jnp.float32, -bound, bound)

    return {
        "conv1_w": u(ks[0], (C1, 1, SW, 3, 3), 1 * SW * 3 * 3),
        "conv1_b": u(ks[1], (C1,), 1 * SW * 3 * 3),
        "conv2_w": u(ks[2], (C2, C1, 1, 3, 3), C1 * 1 * 3 * 3),
        "conv2_b": u(ks[3], (C2,), C1 * 1 * 3 * 3),
        "fc1_w": u(ks[4], (FC1, 128), 128),
        "fc1_b": u(ks[5], (FC1,), 128),
        "fc2_w": u(ks[6], (FC2, FC1), FC1),
        "fc2_b": u(ks[7], (FC2,), FC1),
        "fc3_w": u(ks[8], (1, FC2), FC2),
        "fc3_b": u(ks[9], (1,), FC2),
    }


def to_kernel_params(p):
    """One-time weight preprocessing (plain JAX): fold convs into block-Toeplitz matrices."""
    f32 = jnp.float32

    def shift_sel(n_in, n_out, k):
        # S[a, o, t] = 1 iff a == o + t  (input pos = output pos + tap offset)
        a = jnp.arange(n_in)[:, None, None]
        o = jnp.arange(n_out)[None, :, None]
        t = jnp.arange(k)[None, None, :]
        return (a == o + t).astype(f32)

    # conv1: rows (h, w, d) [512], cols (i, j, co) [144]
    w1 = p["conv1_w"][:, 0]                              # (co, d, kh, kw)
    sh1 = shift_sel(H, H - 2, 3)
    sw1 = shift_sel(W, W - 2, 3)
    W1 = jnp.einsum("hik,wjl,cdkl->hwdijc", sh1, sw1, w1).reshape(IN_FEAT, CONV1_FEAT)
    b1 = jnp.tile(p["conv1_b"], 6 * 6).reshape(1, CONV1_FEAT)

    # conv2: rows (i, j, ci) [144], cols (i', j', co) [128]
    w2 = p["conv2_w"][:, :, 0]                           # (co, ci, kh, kw)
    sh2 = shift_sel(6, 4, 3)
    sw2 = shift_sel(6, 4, 3)
    W2 = jnp.einsum("ipk,jql,ockl->ijcpqo", sh2, sw2, w2).reshape(CONV1_FEAT, CONV2_FEAT)
    b2 = jnp.tile(p["conv2_b"], 4 * 4).reshape(1, CONV2_FEAT)

    # fc1: PyTorch flatten order is (co, i', j'); kernel lane order is (i', j', co)
    wf1 = jnp.transpose(p["fc1_w"].reshape(FC1, C2, 4, 4), (2, 3, 1, 0)).reshape(128, FC1)
    bf1 = p["fc1_b"].reshape(1, FC1)
    wf2 = p["fc2_w"].T
    bf2 = p["fc2_b"].reshape(1, FC2)
    # fc3 zero-padded to 128 output lanes for a lane-dense store (real output is column 0)
    wf3 = jnp.zeros((FC2, OUT_PAD), f32).at[:, 0].set(p["fc3_w"][0])
    bf3 = jnp.zeros((1, OUT_PAD), f32).at[0, 0].set(p["fc3_b"][0])
    return (W1, b1, W2, b2, wf1, bf1, wf2, bf2, wf3, bf3)


# ---------------- pure-JAX reference (mirrors the PyTorch forward exactly) ----------------
def reference_forward(x, p):
    dn = ("NCDHW", "OIDHW", "NCDHW")
    y = lax.conv_general_dilated(x, p["conv1_w"], (1, 1, 1), "VALID", dimension_numbers=dn)
    y = _leaky(y + p["conv1_b"].reshape(1, -1, 1, 1, 1))          # dropout3d = identity (eval)
    y = lax.conv_general_dilated(y, p["conv2_w"], (1, 1, 1), "VALID", dimension_numbers=dn)
    y = _leaky(y + p["conv2_b"].reshape(1, -1, 1, 1, 1))
    y = y.reshape(y.shape[0], -1)                                  # torch.flatten(x, 1)
    y = _leaky(y @ p["fc1_w"].T + p["fc1_b"])                      # dropout = identity (eval)
    y = _leaky(y @ p["fc2_w"].T + p["fc2_b"])
    y = y @ p["fc3_w"].T + p["fc3_b"]
    return y


if __name__ == "__main__":
    key = jax.random.PRNGKey(0)
    pkey, xkey = jax.random.split(key)
    params = init_params(pkey)
    x = jax.random.normal(xkey, (B, 1, SW, H, W), jnp.float32)

    kparams = to_kernel_params(params)
    out = jax.jit(cnn_forward_pallas)(x, kparams)
    out = jax.block_until_ready(out)

    ref = jax.block_until_ready(reference_forward(x, params))
    if not jnp.allclose(out, ref, atol=1e-2, rtol=1e-2):
        raise AssertionError(f"mismatch: pallas={out} ref={ref}")

    print("KERNEL_OK")
</pallas_src>

<mosaic_0001>
module attributes {stable_mosaic.version = 11 : i64} {
  func.func @cnn_kernel(%arg0: i32, %arg1: memref<2x512xf32, #tpu.memory_space<vmem>>, %arg2: memref<512x144xf32, #tpu.memory_space<vmem>>, %arg3: memref<1x144xf32, #tpu.memory_space<vmem>>, %arg4: memref<144x128xf32, #tpu.memory_space<vmem>>, %arg5: memref<1x128xf32, #tpu.memory_space<vmem>>, %arg6: memref<128x40xf32, #tpu.memory_space<vmem>>, %arg7: memref<1x40xf32, #tpu.memory_space<vmem>>, %arg8: memref<40x20xf32, #tpu.memory_space<vmem>>, %arg9: memref<1x20xf32, #tpu.memory_space<vmem>>, %arg10: memref<20x128xf32, #tpu.memory_space<vmem>>, %arg11: memref<1x128xf32, #tpu.memory_space<vmem>>, %arg12: memref<2x128xf32, #tpu.memory_space<vmem>>) attributes {dimension_semantics = [#tpu.dimension_semantics<parallel>], iteration_bounds = array<i64: 1>, scalar_prefetch = 0 : i64, scratch_operands = 0 : i64, tpu.core_type = #tpu.core_type<tc>, window_params = [{transform_indices = @transform_0, window_bounds = array<i64: 2, 512>}, {pipeline_mode = #tpu.pipeline_mode<synchronous>, transform_indices = @transform_1, window_bounds = array<i64: 512, 144>}, {pipeline_mode = #tpu.pipeline_mode<synchronous>, transform_indices = @transform_2, window_bounds = array<i64: 1, 144>}, {pipeline_mode = #tpu.pipeline_mode<synchronous>, transform_indices = @transform_3, window_bounds = array<i64: 144, 128>}, {pipeline_mode = #tpu.pipeline_mode<synchronous>, transform_indices = @transform_4, window_bounds = array<i64: 1, 128>}, {pipeline_mode = #tpu.pipeline_mode<synchronous>, transform_indices = @transform_5, window_bounds = array<i64: 128, 40>}, {pipeline_mode = #tpu.pipeline_mode<synchronous>, transform_indices = @transform_6, window_bounds = array<i64: 1, 40>}, {pipeline_mode = #tpu.pipeline_mode<synchronous>, transform_indices = @transform_7, window_bounds = array<i64: 40, 20>}, {pipeline_mode = #tpu.pipeline_mode<synchronous>, transform_indices = @transform_8, window_bounds = array<i64: 1, 20>}, {pipeline_mode = #tpu.pipeline_mode<synchronous>, transform_indices = @transform_9, window_bounds = array<i64: 20, 128>}, {pipeline_mode = #tpu.pipeline_mode<synchronous>, transform_indices = @transform_10, window_bounds = array<i64: 1, 128>}, {transform_indices = @transform_11, window_bounds = array<i64: 2, 128>}]} {
    %c0 = arith.constant 0 : index
    %c0_0 = arith.constant 0 : index
    %0 = vector.load %arg1[%c0, %c0_0] : memref<2x512xf32, #tpu.memory_space<vmem>>, vector<2x512xf32>
    %c0_1 = arith.constant 0 : index
    %c0_2 = arith.constant 0 : index
    %1 = vector.load %arg2[%c0_1, %c0_2] : memref<512x144xf32, #tpu.memory_space<vmem>>, vector<512x144xf32>
    %cst = arith.constant dense<0.000000e+00> : vector<2x144xf32>
    %2 = tpu.matmul %0, %1, %cst {dimension_numbers = #tpu.dot_dimension_numbers<[1], [0], [0], [1], [0, 0, 1, 1], [], []>} : vector<2x512xf32>, vector<512x144xf32>, vector<2x144xf32> -> vector<2x144xf32>
    %c0_3 = arith.constant 0 : index
    %c0_4 = arith.constant 0 : index
    %3 = vector.load %arg3[%c0_3, %c0_4] : memref<1x144xf32, #tpu.memory_space<vmem>>, vector<1x144xf32>
    %4 = vector.broadcast %3 : vector<1x144xf32> to vector<2x144xf32>
    %5 = arith.addf %2, %4 : vector<2x144xf32>
    %cst_5 = arith.constant 0.000000e+00 : f32
    %6 = vector.broadcast %cst_5 : f32 to vector<2x144xf32>
    %7 = arith.cmpf oge, %5, %6 : vector<2x144xf32>
    %cst_6 = arith.constant 2.000000e-02 : f32
    %8 = vector.broadcast %cst_6 : f32 to vector<2x144xf32>
    %9 = arith.mulf %8, %5 : vector<2x144xf32>
    %10 = arith.select %7, %5, %9 : vector<2x144xi1>, vector<2x144xf32>
    %c0_7 = arith.constant 0 : index
    %c0_8 = arith.constant 0 : index
    %11 = vector.load %arg4[%c0_7, %c0_8] : memref<144x128xf32, #tpu.memory_space<vmem>>, vector<144x128xf32>
    %cst_9 = arith.constant dense<0.000000e+00> : vector<2x128xf32>
    %12 = tpu.matmul %10, %11, %cst_9 {dimension_numbers = #tpu.dot_dimension_numbers<[1], [0], [0], [1], [0, 0, 1, 1], [], []>} : vector<2x144xf32>, vector<144x128xf32>, vector<2x128xf32> -> vector<2x128xf32>
    %c0_10 = arith.constant 0 : index
    %c0_11 = arith.constant 0 : index
    %13 = vector.load %arg5[%c0_10, %c0_11] : memref<1x128xf32, #tpu.memory_space<vmem>>, vector<1x128xf32>
    %14 = vector.broadcast %13 : vector<1x128xf32> to vector<2x128xf32>
    %15 = arith.addf %12, %14 : vector<2x128xf32>
    %cst_12 = arith.constant 0.000000e+00 : f32
    %16 = vector.broadcast %cst_12 : f32 to vector<2x128xf32>
    %17 = arith.cmpf oge, %15, %16 : vector<2x128xf32>
    %cst_13 = arith.constant 2.000000e-02 : f32
    %18 = vector.broadcast %cst_13 : f32 to vector<2x128xf32>
    %19 = arith.mulf %18, %15 : vector<2x128xf32>
    %20 = arith.select %17, %15, %19 : vector<2x128xi1>, vector<2x128xf32>
    %c0_14 = arith.constant 0 : index
    %c0_15 = arith.constant 0 : index
    %21 = vector.load %arg6[%c0_14, %c0_15] : memref<128x40xf32, #tpu.memory_space<vmem>>, vector<128x40xf32>
    %cst_16 = arith.constant dense<0.000000e+00> : vector<2x40xf32>
    %22 = tpu.matmul %20, %21, %cst_16 {dimension_numbers = #tpu.dot_dimension_numbers<[1], [0], [0], [1], [0, 0, 1, 1], [], []>} : vector<2x128xf32>, vector<128x40xf32>, vector<2x40xf32> -> vector<2x40xf32>
    %c0_17 = arith.constant 0 : index
    %c0_18 = arith.constant 0 : index
    %23 = vector.load %arg7[%c0_17, %c0_18] : memref<1x40xf32, #tpu.memory_space<vmem>>, vector<1x40xf32>
    %24 = vector.broadcast %23 : vector<1x40xf32> to vector<2x40xf32>
    %25 = arith.addf %22, %24 : vector<2x40xf32>
    %cst_19 = arith.constant 0.000000e+00 : f32
    %26 = vector.broadcast %cst_19 : f32 to vector<2x40xf32>
    %27 = arith.cmpf oge, %25, %26 : vector<2x40xf32>
    %cst_20 = arith.constant 2.000000e-02 : f32
    %28 = vector.broadcast %cst_20 : f32 to vector<2x40xf32>
    %29 = arith.mulf %28, %25 : vector<2x40xf32>
    %30 = arith.select %27, %25, %29 : vector<2x40xi1>, vector<2x40xf32>
    %c0_21 = arith.constant 0 : index
    %c0_22 = arith.constant 0 : index
    %31 = vector.load %arg8[%c0_21, %c0_22] : memref<40x20xf32, #tpu.memory_space<vmem>>, vector<40x20xf32>
    %cst_23 = arith.constant dense<0.000000e+00> : vector<2x20xf32>
    %32 = tpu.matmul %30, %31, %cst_23 {dimension_numbers = #tpu.dot_dimension_numbers<[1], [0], [0], [1], [0, 0, 1, 1], [], []>} : vector<2x40xf32>, vector<40x20xf32>, vector<2x20xf32> -> vector<2x20xf32>
    %c0_24 = arith.constant 0 : index
    %c0_25 = arith.constant 0 : index
    %33 = vector.load %arg9[%c0_24, %c0_25] : memref<1x20xf32, #tpu.memory_space<vmem>>, vector<1x20xf32>
    %34 = vector.broadcast %33 : vector<1x20xf32> to vector<2x20xf32>
    %35 = arith.addf %32, %34 : vector<2x20xf32>
    %cst_26 = arith.constant 0.000000e+00 : f32
    %36 = vector.broadcast %cst_26 : f32 to vector<2x20xf32>
    %37 = arith.cmpf oge, %35, %36 : vector<2x20xf32>
    %cst_27 = arith.constant 2.000000e-02 : f32
    %38 = vector.broadcast %cst_27 : f32 to vector<2x20xf32>
    %39 = arith.mulf %38, %35 : vector<2x20xf32>
    %40 = arith.select %37, %35, %39 : vector<2x20xi1>, vector<2x20xf32>
    %c0_28 = arith.constant 0 : index
    %c0_29 = arith.constant 0 : index
    %41 = vector.load %arg10[%c0_28, %c0_29] : memref<20x128xf32, #tpu.memory_space<vmem>>, vector<20x128xf32>
    %cst_30 = arith.constant dense<0.000000e+00> : vector<2x128xf32>
    %42 = tpu.matmul %40, %41, %cst_30 {dimension_numbers = #tpu.dot_dimension_numbers<[1], [0], [0], [1], [0, 0, 1, 1], [], []>} : vector<2x20xf32>, vector<20x128xf32>, vector<2x128xf32> -> vector<2x128xf32>
    %c0_31 = arith.constant 0 : index
    %c0_32 = arith.constant 0 : index
    %43 = vector.load %arg11[%c0_31, %c0_32] : memref<1x128xf32, #tpu.memory_space<vmem>>, vector<1x128xf32>
    %44 = vector.broadcast %43 : vector<1x128xf32> to vector<2x128xf32>
    %45 = arith.addf %42, %44 : vector<2x128xf32>
    %c0_33 = arith.constant 0 : index
    %c0_34 = arith.constant 0 : index
    %46 = vector.load %arg12[%c0_33, %c0_34] : memref<2x128xf32, #tpu.memory_space<vmem>>, vector<2x128xf32>
    tpu.vector_store %arg12[%c0_33, %c0_34], %45 {strides = array<i32>} : memref<2x128xf32, #tpu.memory_space<vmem>>, vector<2x128xf32>,
    return
  }
  func.func @transform_0(%arg0: i32) -> (i32, i32) {
    %c0_i32 = arith.constant 0 : i32
    %c0_i32_0 = arith.constant 0 : i32
    return %arg0, %c0_i32 : i32, i32
  }
  func.func @transform_1(%arg0: i32) -> (i32, i32) {
    %c0_i32 = arith.constant 0 : i32
    %c0_i32_0 = arith.constant 0 : i32
    %c0_i32_1 = arith.constant 0 : i32
    return %c0_i32, %c0_i32_0 : i32, i32
  }
  func.func @transform_2(%arg0: i32) -> (i32, i32) {
    %c0_i32 = arith.constant 0 : i32
    %c0_i32_0 = arith.constant 0 : i32
    %c0_i32_1 = arith.constant 0 : i32
    return %c0_i32, %c0_i32_0 : i32, i32
  }
  func.func @transform_3(%arg0: i32) -> (i32, i32) {
    %c0_i32 = arith.constant 0 : i32
    %c0_i32_0 = arith.constant 0 : i32
    %c0_i32_1 = arith.constant 0 : i32
    return %c0_i32, %c0_i32_0 : i32, i32
  }
  func.func @transform_4(%arg0: i32) -> (i32, i32) {
    %c0_i32 = arith.constant 0 : i32
    %c0_i32_0 = arith.constant 0 : i32
    %c0_i32_1 = arith.constant 0 : i32
    return %c0_i32, %c0_i32_0 : i32, i32
  }
  func.func @transform_5(%arg0: i32) -> (i32, i32) {
    %c0_i32 = arith.constant 0 : i32
    %c0_i32_0 = arith.constant 0 : i32
    %c0_i32_1 = arith.constant 0 : i32
    return %c0_i32, %c0_i32_0 : i32, i32
  }
  func.func @transform_6(%arg0: i32) -> (i32, i32) {
    %c0_i32 = arith.constant 0 : i32
    %c0_i32_0 = arith.constant 0 : i32
    %c0_i32_1 = arith.constant 0 : i32
    return %c0_i32, %c0_i32_0 : i32, i32
  }
  func.func @transform_7(%arg0: i32) -> (i32, i32) {
    %c0_i32 = arith.constant 0 : i32
    %c0_i32_0 = arith.constant 0 : i32
    %c0_i32_1 = arith.constant 0 : i32
    return %c0_i32, %c0_i32_0 : i32, i32
  }
  func.func @transform_8(%arg0: i32) -> (i32, i32) {
    %c0_i32 = arith.constant 0 : i32
    %c0_i32_0 = arith.constant 0 : i32
    %c0_i32_1 = arith.constant 0 : i32
    return %c0_i32, %c0_i32_0 : i32, i32
  }
  func.func @transform_9(%arg0: i32) -> (i32, i32) {
    %c0_i32 = arith.constant 0 : i32
    %c0_i32_0 = arith.constant 0 : i32
    %c0_i32_1 = arith.constant 0 : i32
    return %c0_i32, %c0_i32_0 : i32, i32
  }
  func.func @transform_10(%arg0: i32) -> (i32, i32) {
    %c0_i32 = arith.constant 0 : i32
    %c0_i32_0 = arith.constant 0 : i32
    %c0_i32_1 = arith.constant 0 : i32
    return %c0_i32, %c0_i32_0 : i32, i32
  }
  func.func @transform_11(%arg0: i32) -> (i32, i32) {
    %c0_i32 = arith.constant 0 : i32
    %c0_i32_0 = arith.constant 0 : i32
    return %arg0, %c0_i32 : i32, i32
  }
}

</mosaic_0001>

<bundles_post_ra>
// kernel: cnn_forward_pallas.1
= control target key start
LH: loop header
LB: loop body
LE: loop exit
PB: predicated region body
PF: predicated region fallthrough
CT: control target
= control target key end

     0   :  { %v1018_v14 = vmov 0.0|0.0   ;;  %v169_v26 = vlaneseq  ;;  %v1019_v27 = vmov 1983009808   ;;  %vm374_vm1 = vcmask 130048   ;;  %s1660_s1 = inlined_call_operand.vmem [shape: f32[512,144], index: 1, kind: input, shape index: {}]   ;;  %s1661_s0 = inlined_call_operand.vmem [shape: f32[2,512], index: 0, kind: input, shape index: {}]   ;;  %s1662_s3 = inlined_call_operand.vmem [shape: f32[144,128], index: 3, kind: input, shape index: {}]   ;;  %s1663_s2 = inlined_call_operand.vmem [shape: f32[1,144], index: 2, kind: input, shape index: {}]   ;;  %s1664_s5 = inlined_call_operand.vmem [shape: f32[128,40], index: 5, kind: input, shape index: {}]   ;;  %s1665_s4 = inlined_call_operand.vmem [shape: f32[1,128], index: 4, kind: input, shape index: {}]   ;;  %s1666_s7 = inlined_call_operand.vmem [shape: f32[40,20], index: 7, kind: input, shape index: {}]   ;;  %s1667_s6 = inlined_call_operand.vmem [shape: f32[1,40], index: 6, kind: input, shape index: {}]   ;;  %s1668_s9 = inlined_call_operand.vmem [shape: f32[20,128], index: 9, kind: input, shape index: {}]   ;;  %s1669_s8 = inlined_call_operand.vmem [shape: f32[1,20], index: 8, kind: input, shape index: {}]   ;;  %s1670_s10 = inlined_call_operand.vmem [shape: f32[1,128], index: 10, kind: input, shape index: {}]   ;;  %s1671_s11 = inlined_call_operand.vmem [shape: f32[2,128], index: 11, kind: output, shape index: {}]  }
   0x1   :  { %v40_v0 = vld [vmem:[%s1660_s1 + $0x8] sm:$0xff]  ;;  %v42_v1 = vld [vmem:[%s1660_s1 + $0x18] sm:$0xff]  ;;  %v39_v2 = vld [vmem:[%s1660_s1] sm:$0xff]  ;;  %949 = vmatprep.subr.bf16.mxu1 %v1018_v14  ;;  %v182_v28 = vunpack.c.l.s4 %v1019_v27  ;;  %vm1020_vm3 = vmmov 0   ;;  %vm559_vm6 = vcmask 326656   ;;  %vm650_vm7 = vcmask 1043456  }
   0x2   :  { %v821_v3 = vpack.c.bf16 %v42_v1, %v40_v0  ;;  %v41_v4 = vld [vmem:[%s1660_s1 + $0x10] sm:$0xff]  ;;  %v44_v5 = vld [vmem:[%s1660_s1 + $0x28] sm:$0xff]  ;;  %v46_v6 = vld [vmem:[%s1660_s1 + $0x38] sm:$0xff]  ;;  %v1149_v35 = vshrl.u32 %v169_v26, 7  ;;  %vm646_vm9 = vcmask 162816  }
   0x3   :  { %v823_v7 = vpack.c.bf16 %v41_v4, %v39_v2  ;;  %v825_v8 = vpack.c.bf16 %v46_v6, %v44_v5  ;;  %v43_v9 = vld [vmem:[%s1660_s1 + $0x20] sm:$0xff]  ;;  %v45_v10 = vld [vmem:[%s1660_s1 + $0x30] sm:$0xff]  ;;  %v48_v11 = vld [vmem:[%s1660_s1 + $0x48] sm:$0xff]  ;;  %v183_v36 = vunpack.c.0.s8 %v182_v28 }
   0x4   :  { %822 = vmatprep.subr.bf16.mxu0 %v821_v3  ;;  %v50_v12 = vld [vmem:[%s1660_s1 + $0x58] sm:$0xff]  ;;  %v827_v13 = vpack.c.bf16 %v45_v10, %v43_v9  ;;  %v47_v16 = vld [vmem:[%s1660_s1 + $0x40] sm:$0xff]  ;;  %v49_v17 = vld [vmem:[%s1660_s1 + $0x50] sm:$0xff] }
   0x5   :  { %824 = vmatpush1.bf16.msra.mxu0 %v823_v7  ;;  %v829_v15 = vpack.c.bf16 %v50_v12, %v48_v11  ;;  %v52_v18 = vld [vmem:[%s1660_s1 + $0x68] sm:$0xff]  ;;  %v54_v19 = vld [vmem:[%s1660_s1 + $0x78] sm:$0xff]  ;;  %v831_v20 = vpack.c.bf16 %v49_v17, %v47_v16  ;;  %v51_v22 = vld [vmem:[%s1660_s1 + $0x60] sm:$0xff]  ;;  %v1164_v43 = vsub.s32 %v183_v36, %v1149_v35 }
   0x6   :  { %826 = vmatprep.subr.bf16.mxu0 %v825_v8  ;;  %v833_v21 = vpack.c.bf16 %v54_v19, %v52_v18  ;;  %v53_v23 = vld [vmem:[%s1660_s1 + $0x70] sm:$0xff]  ;;  %v56_v24 = vld [vmem:[%s1660_s1 + $0x88] sm:$0xff]  ;;  %v58_v25 = vld [vmem:[%s1660_s1 + $0x98] sm:$0xff] }
   0x7   :  { %v835_v29 = vpack.c.bf16 %v53_v23, %v51_v22  ;;  %v837_v30 = vpack.c.bf16 %v58_v25, %v56_v24  ;;  %v55_v31 = vld [vmem:[%s1660_s1 + $0x80] sm:$0xff]  ;;  %v57_v32 = vld [vmem:[%s1660_s1 + $0x90] sm:$0xff]  ;;  %v60_v33 = vld [vmem:[%s1660_s1 + $0xa8] sm:$0xff] }
   0x8   :  { %v62_v34 = vld [vmem:[%s1660_s1 + $0xb8] sm:$0xff]  ;;  %v839_v37 = vpack.c.bf16 %v57_v32, %v55_v31  ;;  %v59_v39 = vld [vmem:[%s1660_s1 + $0xa0] sm:$0xff]  ;;  %v61_v40 = vld [vmem:[%s1660_s1 + $0xb0] sm:$0xff] }
   0x9   :  { %828 = vmatpush1.bf16.msra.mxu0 %v827_v13  ;;  %v841_v38 = vpack.c.bf16 %v62_v34, %v60_v33  ;;  %v64_v41 = vld [vmem:[%s1660_s1 + $0xc8] sm:$0xff]  ;;  %v66_v42 = vld [vmem:[%s1660_s1 + $0xd8] sm:$0xff]  ;;  %v843_v44 = vpack.c.bf16 %v61_v40, %v59_v39  ;;  %v63_v46 = vld [vmem:[%s1660_s1 + $0xc0] sm:$0xff] }
   0xa   :  { %830 = vmatprep.subr.bf16.mxu0 %v829_v15  ;;  %v845_v45 = vpack.c.bf16 %v66_v42, %v64_v41  ;;  %v65_v47 = vld [vmem:[%s1660_s1 + $0xd0] sm:$0xff]  ;;  %v1175_v48 = vld [vmem:[%s1661_s0] sm:$0xff]  ;;  %v68_v49 = vld [vmem:[%s1660_s1 + $0xe8] sm:$0xff] }
   0xb   :  { %v70_v50 = vld [vmem:[%s1660_s1 + $0xf8] sm:$0xff]  ;;  %v1185_v51 = vrot.slane %v1175_v48, %v1164_v43  ;;  %v847_v52 = vpack.c.bf16 %v65_v47, %v63_v46  ;;  %v67_v55 = vld [vmem:[%s1660_s1 + $0xe0] sm:$0xff]  ;;  %v69_v56 = vld [vmem:[%s1660_s1 + $0xf0] sm:$0xff] }
   0xc   :  { %v849_v54 = vpack.c.bf16 %v70_v50, %v68_v49  ;;  %v72_v57 = vld [vmem:[%s1660_s1 + $0x108] sm:$0xff]  ;;  %v74_v58 = vld [vmem:[%s1660_s1 + $0x118] sm:$0xff]  ;;  %v851_v59 = vpack.c.bf16 %v69_v56, %v67_v55  ;;  %v71_v61 = vld [vmem:[%s1660_s1 + $0x100] sm:$0xff] }
   0xd   :  { %832 = vmatpush1.bf16.msra.mxu0 %v831_v20  ;;  %v195_v53 = vcombine.high %v1185_v51, %v1185_v51  ;;  %v853_v60 = vpack.c.bf16 %v74_v58, %v72_v57  ;;  %v73_v62 = vld [vmem:[%s1660_s1 + $0x110] sm:$0xff]  ;;  %v76_v63 = vld [vmem:[%s1660_s1 + $0x128] sm:$0xff]  ;;  %v78_v0 = vld [vmem:[%s1660_s1 + $0x138] sm:$0xff]  ;;  %v180_v57 = vcombine.high %v1175_v48, %v1175_v48 }
   0xe   :  { %834 = vmatprep.subr.bf16.mxu0 %v833_v21  ;;  %v855_v1 = vpack.c.bf16 %v73_v62, %v71_v61  ;;  %v857_v2 = vpack.c.bf16 %v78_v0, %v76_v63  ;;  %v75_v3 = vld [vmem:[%s1660_s1 + $0x120] sm:$0xff]  ;;  %v77_v4 = vld [vmem:[%s1660_s1 + $0x130] sm:$0xff]  ;;  %v80_v5 = vld [vmem:[%s1660_s1 + $0x148] sm:$0xff] }
   0xf   :  { %265 = vmatprep.mubr.f32.mxu0 %v195_v53  ;;  %v82_v6 = vld [vmem:[%s1660_s1 + $0x158] sm:$0xff]  ;;  %v859_v7 = vpack.c.bf16 %v77_v4, %v75_v3  ;;  %v79_v9 = vld [vmem:[%s1660_s1 + $0x140] sm:$0xff]  ;;  %v81_v10 = vld [vmem:[%s1660_s1 + $0x150] sm:$0xff] }
  0x10   :  { %v861_v8 = vpack.c.bf16 %v82_v6, %v80_v5  ;;  %v84_v11 = vld [vmem:[%s1660_s1 + $0x168] sm:$0xff]  ;;  %v86_v12 = vld [vmem:[%s1660_s1 + $0x178] sm:$0xff]  ;;  %v863_v13 = vpack.c.bf16 %v81_v10, %v79_v9  ;;  %v83_v16 = vld [vmem:[%s1660_s1 + $0x160] sm:$0xff] }
  0x11   :  { %836 = vmatpush1.bf16.msra.mxu0 %v835_v29  ;;  %v865_v15 = vpack.c.bf16 %v86_v12, %v84_v11  ;;  %v85_v17 = vld [vmem:[%s1660_s1 + $0x170] sm:$0xff]  ;;  %v88_v18 = vld [vmem:[%s1660_s1 + $0x188] sm:$0xff]  ;;  %v90_v19 = vld [vmem:[%s1660_s1 + $0x198] sm:$0xff] }
  0x12   :  { %838 = vmatprep.subr.bf16.mxu0 %v837_v30  ;;  %v349_v20 = vld [vmem:[%s1662_s3] sm:$0xff]  ;;  %v350_v21 = vld [vmem:[%s1662_s3 + $0x8] sm:$0xff]  ;;  %v351_v22 = vld [vmem:[%s1662_s3 + $0x10] sm:$0xff]  ;;  %v867_v23 = vpack.c.bf16 %v85_v17, %v83_v16  ;;  %v869_v26 = vpack.c.bf16 %v90_v19, %v88_v18 }
  0x13   :  { %v950_v24 = vpack.c.bf16 %v350_v21, %v349_v20  ;;  %v352_v25 = vld [vmem:[%s1662_s3 + $0x18] sm:$0xff]  ;;  %v87_v27 = vld [vmem:[%s1660_s1 + $0x180] sm:$0xff]  ;;  %v89_v28 = vld [vmem:[%s1660_s1 + $0x190] sm:$0xff] }
  0x14   :  { %v92_v29 = vld [vmem:[%s1660_s1 + $0x1a8] sm:$0xff]  ;;  %v94_v30 = vld [vmem:[%s1660_s1 + $0x1b8] sm:$0xff]  ;;  %v953_v31 = vpack.c.bf16 %v352_v25, %v351_v22  ;;  %v353_v32 = vld [vmem:[%s1662_s3 + $0x20] sm:$0xff]  ;;  %v871_v34 = vpack.c.bf16 %v89_v28, %v87_v27 }
  0x15   :  { %840 = vmatpush1.bf16.msra.mxu0 %v839_v37  ;;  %951 = vmatpush1.bf16.msra.mxu1 %v950_v24  ;;  %v354_v33 = vld [vmem:[%s1662_s3 + $0x28] sm:$0xff]  ;;  %v873_v36 = vpack.c.bf16 %v94_v30, %v92_v29  ;;  %v91_v37 = vld [vmem:[%s1660_s1 + $0x1a0] sm:$0xff]  ;;  %v98_v40 = vld [vmem:[%s1660_s1 + $0x1d8] sm:$0xff] }
  0x16   :  { %842 = vmatprep.subr.bf16.mxu0 %v841_v38  ;;  %952 = vmatprep.subr.bf16.mxu1 %v1018_v14  ;;  %v93_v38 = vld [vmem:[%s1660_s1 + $0x1b0] sm:$0xff]  ;;  %v96_v39 = vld [vmem:[%s1660_s1 + $0x1c8] sm:$0xff]  ;;  %v956_v41 = vpack.c.bf16 %v354_v33, %v353_v32  ;;  %v95_v47 = vld [vmem:[%s1660_s1 + $0x1c0] sm:$0xff] }
  0x17   :  { %v355_v42 = vld [vmem:[%s1662_s3 + $0x30] sm:$0xff]  ;;  %v877_v46 = vpack.c.bf16 %v98_v40, %v96_v39  ;;  %v100_v50 = vld [vmem:[%s1660_s1 + $0x1e8] sm:$0xff]  ;;  %v106_v62 = vld [vmem:[%s1660_s1 + $0x218] sm:$0xff] }
  0x18   :  { %v97_v49 = vld [vmem:[%s1660_s1 + $0x1d0] sm:$0xff]  ;;  %v358_v55 = vld [vmem:[%s1662_s3 + $0x48] sm:$0xff]  ;;  %v360_v0 = vld [vmem:[%s1662_s3 + $0x58] sm:$0xff] }
  0x19   :  { %844 = vmatpush1.bf16.msra.mxu0 %v843_v44  ;;  %954 = vmatpush1.bf16.msra.mxu1 %v953_v31  ;;  %v356_v44 = vld [vmem:[%s1662_s3 + $0x38] sm:$0xff]  ;;  %v879_v56 = vpack.c.bf16 %v97_v49, %v95_v47  ;;  %v104_v61 = vld [vmem:[%s1660_s1 + $0x208] sm:$0xff]  ;;  %v359_v63 = vld [vmem:[%s1662_s3 + $0x50] sm:$0xff] }
  0x1a   :  { %846 = vmatprep.subr.bf16.mxu0 %v845_v45  ;;  %955 = vmatprep.subr.bf16.mxu1 %v1018_v14  ;;  %v875_v45 = vpack.c.bf16 %v93_v38, %v91_v37  ;;  %v959_v53 = vpack.c.bf16 %v356_v44, %v355_v42  ;;  %v885_v3 = vpack.c.bf16 %v106_v62, %v104_v61  ;;  %v103_v4 = vld [vmem:[%s1660_s1 + $0x200] sm:$0xff]  ;;  %v105_v5 = vld [vmem:[%s1660_s1 + $0x210] sm:$0xff]  ;;  %v108_v6 = vld [vmem:[%s1660_s1 + $0x228] sm:$0xff] }
  0x1b   :  { %v362_v9 = vld [vmem:[%s1662_s3 + $0x68] sm:$0xff]  ;;  %v887_v10 = vpack.c.bf16 %v105_v5, %v103_v4  ;;  %v114_v17 = vld [vmem:[%s1660_s1 + $0x258] sm:$0xff]  ;;  %v111_v21 = vld [vmem:[%s1660_s1 + $0x240] sm:$0xff] }
  0x1c   :  { %v112_v16 = vld [vmem:[%s1660_s1 + $0x248] sm:$0xff]  ;;  %v113_v22 = vld [vmem:[%s1660_s1 + $0x250] sm:$0xff]  ;;  %v122_v29 = vld [vmem:[%s1660_s1 + $0x298] sm:$0xff] }
  0x1d   :  { %848 = vmatpush1.bf16.msra.mxu0 %v847_v52  ;;  %v102_v52 = vld [vmem:[%s1660_s1 + $0x1f8] sm:$0xff]  ;;  %957 = vmatpush1.bf16.msra.mxu1 %v956_v41  ;;  %v893_v20 = vpack.c.bf16 %v114_v17, %v112_v16  ;;  %v895_v24 = vpack.c.bf16 %v113_v22, %v111_v21  ;;  %v117_v27 = vld [vmem:[%s1660_s1 + $0x270] sm:$0xff]  ;;  %v120_v28 = vld [vmem:[%s1660_s1 + $0x288] sm:$0xff] }
  0x1e   :  { %850 = vmatprep.subr.bf16.mxu0 %v849_v54  ;;  %958 = vmatprep.subr.bf16.mxu1 %v1018_v14  ;;  %v357_v54 = vld [vmem:[%s1662_s3 + $0x40] sm:$0xff]  ;;  %v881_v58 = vpack.c.bf16 %v102_v52, %v100_v50  ;;  %v901_v31 = vpack.c.bf16 %v122_v29, %v120_v28  ;;  %v121_v33 = vld [vmem:[%s1660_s1 + $0x290] sm:$0xff]  ;;  %v128_v41 = vld [vmem:[%s1660_s1 + $0x2c8] sm:$0xff] }
  0x1f   :  { %v962_v48 = vpack.c.bf16 %v358_v55, %v357_v54  ;;  %v119_v32 = vld [vmem:[%s1660_s1 + $0x280] sm:$0xff]  ;;  %v125_v40 = vld [vmem:[%s1660_s1 + $0x2b0] sm:$0xff]  ;;  %v130_v42 = vld [vmem:[%s1660_s1 + $0x2d8] sm:$0xff] }
  0x20   :  { %v903_v37 = vpack.c.bf16 %v121_v33, %v119_v32  ;;  %v123_v39 = vld [vmem:[%s1660_s1 + $0x2a0] sm:$0xff]  ;;  %v129_v47 = vld [vmem:[%s1660_s1 + $0x2d0] sm:$0xff]  ;;  %v132_v49 = vld [vmem:[%s1660_s1 + $0x2e8] sm:$0xff] }
  0x21   :  { %852 = vmatpush1.bf16.msra.mxu0 %v851_v59  ;;  %v99_v59 = vld [vmem:[%s1660_s1 + $0x1e0] sm:$0xff]  ;;  %960 = vmatpush1.bf16.msra.mxu1 %v959_v53  ;;  %v907_v44 = vpack.c.bf16 %v125_v40, %v123_v39  ;;  %v134_v50 = vld [vmem:[%s1660_s1 + $0x2f8] sm:$0xff]  ;;  %v133_v55 = vld [vmem:[%s1660_s1 + $0x2f0] sm:$0xff] }
  0x22   :  { %854 = vmatprep.subr.bf16.mxu0 %v853_v60  ;;  %v101_v60 = vld [vmem:[%s1660_s1 + $0x1f0] sm:$0xff]  ;;  %961 = vmatprep.subr.bf16.mxu1 %v1018_v14  ;;  %v913_v53 = vpack.c.bf16 %v134_v50, %v132_v49  ;;  %v131_v54 = vld [vmem:[%s1660_s1 + $0x2e0] sm:$0xff]  ;;  %v140_v62 = vld [vmem:[%s1660_s1 + $0x328] sm:$0xff]  ;;  %v175_v50 = vsub.s32 1, %v1149_v35 }
  0x23   :  { %v137_v61 = vld [vmem:[%s1660_s1 + $0x310] sm:$0xff]  ;;  %v144_v4 = vld [vmem:[%s1660_s1 + $0x348] sm:$0xff]  ;;  %v146_v5 = vld [vmem:[%s1660_s1 + $0x358] sm:$0xff] }
  0x24   :  { %v152_v16 = vld [vmem:[%s1660_s1 + $0x388] sm:$0xff]  ;;  %v154_v17 = vld [vmem:[%s1660_s1 + $0x398] sm:$0xff]  ;;  %v153_v21 = vld [vmem:[%s1660_s1 + $0x390] sm:$0xff] }
  0x25   :  { %856 = vmatpush1.bf16.msra.mxu0 %v855_v1  ;;  %v883_v1 = vpack.c.bf16 %v101_v60, %v99_v59  ;;  %963 = vmatpush1.bf16.msra.mxu1 %v962_v48  ;;  %v135_v60 = vld [vmem:[%s1660_s1 + $0x300] sm:$0xff]  ;;  %v142_v48 = vld [vmem:[%s1660_s1 + $0x338] sm:$0xff]  ;;  %v156_v22 = vld [vmem:[%s1660_s1 + $0x3a8] sm:$0xff] }
  0x26   :  { %858 = vmatprep.subr.bf16.mxu0 %v857_v2  ;;  %v1340_v2 = vrot.slane %v180_v57, %v1164_v43  ;;  %v965_v43 = vpack.c.bf16 %v360_v0, %v359_v63  ;;  %964 = vmatprep.subr.bf16.mxu1 %v1018_v14  ;;  %v138_v57 = vld [vmem:[%s1660_s1 + $0x318] sm:$0xff]  ;;  %v919_v63 = vpack.c.bf16 %v137_v61, %v135_v60  ;;  %v161_v32 = vld [vmem:[%s1660_s1 + $0x3d0] sm:$0xff]  ;;  %v164_v33 = vld [vmem:[%s1660_s1 + $0x3e8] sm:$0xff] }
  0x27   :  { %v921_v0 = vpack.c.bf16 %v142_v48, %v140_v62  ;;  %v162_v28 = vld [vmem:[%s1660_s1 + $0x3d8] sm:$0xff]  ;;  %v165_v39 = vld [vmem:[%s1660_s1 + $0x3f0] sm:$0xff]  ;;  %v167_v49 = vld [vmem:[%s1663_s2] sm:$0x3] }
  0x28   :  { %v196_v11 = vcombine.high %v1340_v2, %v1340_v2  ;;  %v453_v48 = vld [vmem:[%s1664_s5 + $0x10] sm:$0xff] }
  0x29   :  { %860 = vmatpush1.bf16.msra.mxu0 %v859_v7  ;;  %v110_v7 = vld [vmem:[%s1660_s1 + $0x238] sm:$0xff]  ;;  %966 = vmatpush1.bf16.msra.mxu1 %v965_v43  ;;  %v143_v43 = vld [vmem:[%s1660_s1 + $0x340] sm:$0xff] }
  0x2a   :  { %862 = vmatprep.subr.bf16.mxu0 %v861_v8  ;;  %v361_v8 = vld [vmem:[%s1662_s3 + $0x60] sm:$0xff]  ;;  %v889_v12 = vpack.c.bf16 %v110_v7, %v108_v6  ;;  %967 = vmatprep.subr.bf16.mxu1 %v1018_v14  ;;  %v925_v7 = vpack.c.bf16 %v146_v5, %v144_v4  ;;  %v456_v4 = vld [vmem:[%s1664_s5 + $0x28] sm:$0xff] }
  0x2b   :  { %v968_v18 = vpack.c.bf16 %v362_v9, %v361_v8  ;;  %v145_v8 = vld [vmem:[%s1660_s1 + $0x350] sm:$0xff]  ;;  %v148_v9 = vld [vmem:[%s1660_s1 + $0x368] sm:$0xff] }
  0x2d   :  { %864 = vmatpush1.bf16.msra.mxu0 %v863_v13  ;;  %v107_v13 = vld [vmem:[%s1660_s1 + $0x220] sm:$0xff]  ;;  %969 = vmatpush1.bf16.msra.mxu1 %v968_v18 }
  0x2e   :  { %866 = vmatprep.subr.bf16.mxu0 %v865_v15  ;;  %v109_v15 = vld [vmem:[%s1660_s1 + $0x230] sm:$0xff]  ;;  %970 = vmatprep.subr.bf16.mxu1 %v1018_v14 }
  0x2f   :  { %v891_v19 = vpack.c.bf16 %v109_v15, %v107_v13  ;;  %v147_v13 = vld [vmem:[%s1660_s1 + $0x360] sm:$0xff]  ;;  %v149_v15 = vld [vmem:[%s1660_s1 + $0x370] sm:$0xff] }
  0x30   :  { %v931_v18 = vpack.c.bf16 %v149_v15, %v147_v13  ;;  %v463_v15 = vld [vmem:[%s1664_s5 + $0x60] sm:$0xff] }
  0x31   :  { %868 = vmatpush1.bf16.msra.mxu0 %v867_v23  ;;  %v116_v23 = vld [vmem:[%s1660_s1 + $0x268] sm:$0xff] }
  0x32   :  { %870 = vmatprep.subr.bf16.mxu0 %v869_v26  ;;  %v115_v26 = vld [vmem:[%s1660_s1 + $0x260] sm:$0xff] }
  0x33   :  { %v899_v30 = vpack.c.bf16 %v117_v27, %v115_v26  ;;  %v157_v26 = vld [vmem:[%s1660_s1 + $0x3b0] sm:$0xff]  ;;  %v160_v27 = vld [vmem:[%s1660_s1 + $0x3c8] sm:$0xff] }
  0x35   :  { %872 = vmatpush1.bf16.msra.mxu0 %v871_v34  ;;  %v124_v34 = vld [vmem:[%s1660_s1 + $0x2a8] sm:$0xff] }
  0x36   :  { %874 = vmatprep.subr.bf16.mxu0 %v873_v36  ;;  %v126_v36 = vld [vmem:[%s1660_s1 + $0x2b8] sm:$0xff] }
  0x37   :  { %v905_v38 = vpack.c.bf16 %v126_v36, %v124_v34  ;;  %v166_v34 = vld [vmem:[%s1660_s1 + $0x3f8] sm:$0xff] }
  0x39   :  { %876 = vmatpush1.bf16.msra.mxu0 %v875_v45  ;;  %v909_v45 = vpack.c.bf16 %v130_v42, %v128_v41  ;;  %v363_v41 = vld [vmem:[%s1662_s3 + $0x70] sm:$0xff]  ;;  %v364_v42 = vld [vmem:[%s1662_s3 + $0x78] sm:$0xff] }
  0x3a   :  { %878 = vmatprep.subr.bf16.mxu0 %v877_v46  ;;  %v127_v46 = vld [vmem:[%s1660_s1 + $0x2c0] sm:$0xff] }
  0x3b   :  { %v911_v52 = vpack.c.bf16 %v129_v47, %v127_v46  ;;  %v171_v47 = vsub.s32 0, %v1149_v35 }
  0x3d   :  { %880 = vmatpush1.bf16.msra.mxu0 %v879_v56  ;;  %v136_v56 = vld [vmem:[%s1660_s1 + $0x308] sm:$0xff] }
  0x3e   :  { %882 = vmatprep.subr.bf16.mxu0 %v881_v58  ;;  %v915_v58 = vpack.c.bf16 %v133_v55, %v131_v54  ;;  %v917_v59 = vpack.c.bf16 %v138_v57, %v136_v56 }
  0x41   :  { %884 = vmatpush1.bf16.msra.mxu0 %v883_v1  ;;  %v139_v1 = vld [vmem:[%s1660_s1 + $0x320] sm:$0xff] }
  0x42   :  { %886 = vmatprep.subr.bf16.mxu0 %v885_v3  ;;  %v141_v3 = vld [vmem:[%s1660_s1 + $0x330] sm:$0xff] }
  0x43   :  { %v923_v6 = vpack.c.bf16 %v141_v3, %v139_v1  ;;  %v455_v3 = vld [vmem:[%s1664_s5 + $0x20] sm:$0xff] }
  0x44   :  { %266 = vmatmul.mubr.f32.vlgmr.msra.gmra.mrb[0].mxu0 %v1185_v51  ;;  %v118_v51 = vld [vmem:[%s1660_s1 + $0x278] sm:$0xff]  ;;  %v983_v5 = vpack.c.bf16 %v456_v4, %v455_v3 }
  0x45   :  { %888 = vmatpush1.bf16.msra.mxu0 %v887_v10  ;;  %336 = vmatprep.mubr.f32.mxu0 %v196_v11  ;;  %v897_v25 = vpack.c.bf16 %v118_v51, %v116_v23  ;;  %v150_v10 = vld [vmem:[%s1660_s1 + $0x378] sm:$0xff]  ;;  %v927_v11 = vpack.c.bf16 %v145_v8, %v143_v43  ;;  %v459_v8 = vld [vmem:[%s1664_s5 + $0x40] sm:$0xff] }
  0x46   :  { %890 = vmatprep.subr.bf16.mxu0 %v889_v12  ;;  %v929_v12 = vpack.c.bf16 %v150_v10, %v148_v9  ;;  %v158_v23 = vld [vmem:[%s1660_s1 + $0x3b8] sm:$0xff]  ;;  %v460_v9 = vld [vmem:[%s1664_s5 + $0x48] sm:$0xff] }
  0x47   :  { %v989_v10 = vpack.c.bf16 %v460_v9, %v459_v8 }
  0x49   :  { %892 = vmatpush1.bf16.msra.mxu0 %v891_v19  ;;  %v933_v19 = vpack.c.bf16 %v154_v17, %v152_v16  ;;  %v464_v16 = vld [vmem:[%s1664_s5 + $0x68] sm:$0xff] }
  0x4a   :  { %894 = vmatprep.subr.bf16.mxu0 %v893_v20  ;;  %v151_v20 = vld [vmem:[%s1660_s1 + $0x380] sm:$0xff]  ;;  %v995_v17 = vpack.c.bf16 %v464_v16, %v463_v15 }
  0x4b   :  { %v935_v51 = vpack.c.bf16 %v153_v21, %v151_v20  ;;  %v1021_v21 = vmov 0.0  }
  0x4d   :  { %896 = vmatpush1.bf16.msra.mxu0 %v895_v24  ;;  %v937_v24 = vpack.c.bf16 %v158_v23, %v156_v22  ;;  %v729_v22 = vld [vmem:[%s1665_s4] ss:$0 sm:$0xff] }
  0x4e   :  { %898 = vmatprep.subr.bf16.mxu0 %v897_v25  ;;  %v155_v25 = vld [vmem:[%s1660_s1 + $0x3a0] sm:$0xff] }
  0x4f   :  { %v939_v29 = vpack.c.bf16 %v157_v26, %v155_v25 }
  0x51   :  { %900 = vmatpush1.bf16.msra.mxu0 %v899_v30  ;;  %v941_v30 = vpack.c.bf16 %v162_v28, %v160_v27 }
  0x52   :  { %902 = vmatprep.subr.bf16.mxu0 %v901_v31  ;;  %v159_v31 = vld [vmem:[%s1660_s1 + $0x3c0] sm:$0xff] }
  0x53   :  { %v943_v36 = vpack.c.bf16 %v161_v32, %v159_v31  ;;  %v550_v31 = vld [vmem:[%s1666_s7 + $0x18] sm:$0xff] }
  0x55   :  { %904 = vmatpush1.bf16.msra.mxu0 %v903_v37  ;;  %v945_v37 = vpack.c.bf16 %v166_v34, %v164_v33  ;;  %v551_v33 = vld [vmem:[%s1666_s7 + $0x20] sm:$0xff] }
  0x56   :  { %906 = vmatprep.subr.bf16.mxu0 %v905_v38  ;;  %v163_v38 = vld [vmem:[%s1660_s1 + $0x3e0] sm:$0xff] }
  0x57   :  { %v947_v40 = vpack.c.bf16 %v165_v39, %v163_v38  ;;  %v731_v34 = vld [vmem:[%s1667_s6] ss:$0 sm:$0xff] }
  0x59   :  { %908 = vmatpush1.bf16.msra.mxu0 %v907_v44  ;;  %v971_v44 = vpack.c.bf16 %v364_v42, %v363_v41  ;;  %v636_v41 = vld [vmem:[%s1668_s9] sm:$0xff] }
  0x5a   :  { %910 = vmatprep.subr.bf16.mxu0 %v909_v45  ;;  %v365_v45 = vld [vmem:[%s1662_s3 + $0x80] sm:$0xff] }
  0x5b   :  { %972 = vmatpush1.bf16.msra.mxu1 %v971_v44  ;;  %v638_v44 = vld [vmem:[%s1668_s9 + $0x10] sm:$0xf] }
  0x5c   :  { %973 = vmatprep.subr.bf16.mxu1 %v1018_v14 }
  0x5d   :  { %912 = vmatpush1.bf16.msra.mxu0 %v911_v52  ;;  %v172_v52 = vrot.slane %v167_v49, %v171_v47 }
  0x5e   :  { %914 = vmatprep.subr.bf16.mxu0 %v913_v53  ;;  %v176_v53 = vrot.slane %v167_v49, %v175_v50 }
  0x61   :  { %916 = vmatpush1.bf16.msra.mxu0 %v915_v58  ;;  %v451_v58 = vld [vmem:[%s1664_s5] sm:$0xff] }
  0x62   :  { %918 = vmatprep.subr.bf16.mxu0 %v917_v59  ;;  %v452_v59 = vld [vmem:[%s1664_s5 + $0x8] sm:$0xff] }
  0x63   :  { %v977_v35 = vpack.c.bf16 %v452_v59, %v451_v58 }
  0x65   :  { %920 = vmatpush1.bf16.msra.mxu0 %v919_v63  ;;  %v454_v63 = vld [vmem:[%s1664_s5 + $0x18] sm:$0xff] }
  0x66   :  { %922 = vmatprep.subr.bf16.mxu0 %v921_v0  ;;  %v980_v1 = vpack.c.bf16 %v454_v63, %v453_v48 }
  0x69   :  { %924 = vmatpush1.bf16.msra.mxu0 %v923_v6  ;;  %v457_v6 = vld [vmem:[%s1664_s5 + $0x30] sm:$0xff] }
  0x6a   :  { %926 = vmatprep.subr.bf16.mxu0 %v925_v7  ;;  %v458_v7 = vld [vmem:[%s1664_s5 + $0x38] sm:$0xff] }
  0x6b   :  { %v986_v43 = vpack.c.bf16 %v458_v7, %v457_v6 }
  0x6d   :  { %928 = vmatpush1.bf16.msra.mxu0 %v927_v11  ;;  %v461_v11 = vld [vmem:[%s1664_s5 + $0x50] sm:$0xff] }
  0x6e   :  { %930 = vmatprep.subr.bf16.mxu0 %v929_v12  ;;  %v462_v12 = vld [vmem:[%s1664_s5 + $0x58] sm:$0xff] }
  0x6f   :  { %v992_v13 = vpack.c.bf16 %v462_v12, %v461_v11 }
  0x71   :  { %932 = vmatpush1.bf16.msra.mxu0 %v931_v18  ;;  %v465_v18 = vld [vmem:[%s1664_s5 + $0x70] sm:$0xff] }
  0x72   :  { %934 = vmatprep.subr.bf16.mxu0 %v933_v19  ;;  %v466_v19 = vld [vmem:[%s1664_s5 + $0x78] sm:$0xff] }
  0x73   :  { %v998_v20 = vpack.c.bf16 %v466_v19, %v465_v18 }
  0x75   :  { %936 = vmatpush1.bf16.msra.mxu0 %v935_v51  ;;  %v547_v51 = vld [vmem:[%s1666_s7] sm:$0xff] }
  0x76   :  { %938 = vmatprep.subr.bf16.mxu0 %v937_v24  ;;  %v548_v24 = vld [vmem:[%s1666_s7 + $0x8] sm:$0xff] }
  0x77   :  { %v1001_v28 = vpack.c.bf16 %v548_v24, %v547_v51 }
  0x79   :  { %940 = vmatpush1.bf16.msra.mxu0 %v939_v29 }
  0x7a   :  { %942 = vmatprep.subr.bf16.mxu0 %v941_v30  ;;  %v549_v30 = vld [vmem:[%s1666_s7 + $0x10] sm:$0xff] }
  0x7b   :  { %v1004_v32 = vpack.c.bf16 %v550_v31, %v549_v30 }
  0x7d   :  { %944 = vmatpush1.bf16.msra.mxu0 %v943_v36 }
  0x7e   :  { %946 = vmatprep.subr.bf16.mxu0 %v945_v37 }
  0x81   :  { %948 = vmatpush1.bf16.msra.mxu0 %v947_v40 }
  0x84   :  { %337 = vmatmul.mubr.f32.vlgmr.msra.gmra.mrb[0].mxu0 %v1340_v2  ;;  %v366_v2 = vld [vmem:[%s1662_s3 + $0x88] sm:$0xff] }
  0x85   :  { %v974_v46 = vpack.c.bf16 %v366_v2, %v365_v45  ;;  %v732_v45 = vld [vmem:[%s1669_s8] ss:$0 sm:$0xff] }
  0x87   :  { %975 = vmatpush1.bf16.msra.mxu1 %v974_v46 }
  0x88   :  { %976 = vmatprep.subr.bf16.mxu1 %v1018_v14 }
 0x157   :  { %v338_v54 = vpop.f32.mrb[0].mxu0 }
 0x158   :  { %v1009_v55 = vadd.f32 %v338_v54, %v172_v52  ;;  %v340_v56 = vpop.f32.mrb[1].mxu0  ;;  %v734_v52 = vld [vmem:[%s1670_s10] ss:$0 sm:$0xff] }
 0x159   :  { %v1010_v57 = vadd.f32 %v340_v56, %v176_v53 }
 0x15a   :  { %v345_v60 = vmul.f32 0.02, %v1009_v55  ;;  %vm343_vm2 = vcmp.ge.f32.partialorder %v1009_v55, 0.0 }
 0x15b   :  { %vm344_vm0 = vcmp.ge.f32.partialorder %v1010_v57, 0.0  ;;  %v346_v61 = vmul.f32 0.02, %v1010_v57 }
 0x15c   :  { %v347_v0 = vsel %vm343_vm2, %v1009_v55, %v345_v60 }
 0x15d   :  { %v348_v62 = vsel %vm344_vm0, %v1010_v57, %v346_v61 }
 0x15e   :  { %730 = vmatprep.mubr.msk.f32.mxu1 %vm374_vm1, %v348_v62 }
 0x15f   :  { %443 = vmatmul.mubr.f32.vlgmr.msra.gmra.mrb[0].mxu1 %v347_v0 }
 0x160   :  { %978 = vmatpush3.bf16.msra.mxu1 %v977_v35  ;;  %796 = vmatprep.mubr.msk.f32.mxu1 %vm1020_vm3, %v1021_v21 }
 0x161   :  { %979 = vmatprep.subr.bf16.mxu1 %v1018_v14 }
 0x164   :  { %981 = vmatpush3.bf16.msra.mxu1 %v980_v1 }
 0x165   :  { %982 = vmatprep.subr.bf16.mxu1 %v1018_v14 }
 0x168   :  { %984 = vmatpush3.bf16.msra.mxu1 %v983_v5 }
 0x169   :  { %985 = vmatprep.subr.bf16.mxu1 %v1018_v14 }
 0x16c   :  { %987 = vmatpush3.bf16.msra.mxu1 %v986_v43 }
 0x16d   :  { %988 = vmatprep.subr.bf16.mxu1 %v1018_v14 }
 0x170   :  { %990 = vmatpush3.bf16.msra.mxu1 %v989_v10 }
 0x171   :  { %991 = vmatprep.subr.bf16.mxu1 %v1018_v14 }
 0x174   :  { %993 = vmatpush3.bf16.msra.mxu1 %v992_v13 }
 0x175   :  { %994 = vmatprep.subr.bf16.mxu1 %v1018_v14 }
 0x178   :  { %996 = vmatpush3.bf16.msra.mxu1 %v995_v17 }
 0x179   :  { %997 = vmatprep.subr.bf16.mxu1 %v1018_v14 }
 0x17c   :  { %999 = vmatpush3.bf16.msra.mxu1 %v998_v20 }
 0x17d   :  { %1000 = vmatprep.subr.bf16.mxu1 %v1018_v14 }
 0x232   :  { %v444_v23 = vpop.f32.mrb[0].mxu1 }
 0x233   :  { %v445_v25 = vadd.f32 %v729_v22, %v444_v23  ;;  %v446_v26 = vpop.f32.mrb[1].mxu1 }
 0x235   :  { %vm448_vm4 = vcmp.ge.f32.partialorder %v445_v25, 0.0  ;;  %v449_v27 = vmul.f32 0.02, %v445_v25 }
 0x237   :  { %v450_v29 = vsel %vm448_vm4, %v445_v25, %v449_v27 }
 0x238   :  { %797 = vmatmul.mubr.f32.vlgmr.msra.gmra.mrb[2].mxu1 %v450_v29 }
 0x239   :  { %1002 = vmatpush3.bf16.msra.mxu1 %v1001_v28  ;;  %809 = vmatprep.mubr.msk.f32.mxu1 %vm1020_vm3, %v1021_v21 }
 0x23a   :  { %1003 = vmatprep.subr.bf16.mxu1 %v1018_v14 }
 0x23d   :  { %1005 = vmatpush3.bf16.msra.mxu1 %v1004_v32 }
 0x23e   :  { %807 = vmatprep.subr.mxu1 %v1021_v21 }
 0x241   :  { %808 = vmatpush3.msra.mxu1 %v551_v33 }
 0x242   :  { %1006 = vmatprep.subr.bf16.mxu1 %v1018_v14  ;;  %v637_v14 = vld [vmem:[%s1668_s9 + $0x8] sm:$0xff] }
 0x243   :  { %v1007_v42 = vpack.c.bf16 %v637_v14, %v636_v41 }
 0x30b   :  { %v540_v36 = vpop.f32.mrb[2].mxu1 }
 0x30c   :  { %v541_v37 = vadd.f32 %v731_v34, %v540_v36  ;;  %v798_v38 = vpop.f32.mrb[3].mxu1 }
 0x30e   :  { %vm544_vm5 = vcmp.ge.f32.partialorder %v541_v37, 0.0  ;;  %v545_v39 = vmul.f32 0.02, %v541_v37 }
 0x310   :  { %v546_v40 = vsel %vm544_vm5, %v541_v37, %v545_v39 }
 0x311   :  { %810 = vmatmul.mubr.msk.f32.vlgmr.msra.gmra.mrb[4].mxu1 %vm559_vm6, %v546_v40 }
 0x312   :  { %818 = vmatprep.mubr.msk.f32.mxu1 %vm1020_vm3, %v1021_v21  ;;  %1008 = vmatpush3.bf16.msra.mxu1 %v1007_v42 }
 0x313   :  { %816 = vmatprep.subr.mxu1 %v1021_v21 }
 0x316   :  { %817 = vmatpush3.msk.msra.mxu1 %vm650_vm7, %v638_v44 }
 0x3e4   :  { %v629_v2 = vpop.f32.mrb[4].mxu1 }
 0x3e5   :  { %v630_v46 = vadd.f32 %v732_v45, %v629_v2  ;;  %v811_v47 = vpop.f32.mrb[5].mxu1 }
 0x3e7   :  { %vm633_vm8 = vcmp.ge.f32.partialorder %v630_v46, 0.0  ;;  %v634_v49 = vmul.f32 0.02, %v630_v46 }
 0x3e9   :  { %v635_v50 = vsel %vm633_vm8, %v630_v46, %v634_v49 }
 0x3ea   :  { %819 = vmatmul.mubr.msk.f32.vlgmr.msra.gmra.mrb[6].mxu1 %vm646_vm9, %v635_v50 }
 0x4bd   :  { %v720_v53 = vpop.f32.mrb[6].mxu1 }
 0x4be   :  { %v721_v54 = vadd.f32 %v734_v52, %v720_v53  ;;  %v820_v55 = vpop.f32.mrb[7].mxu1 }
 0x4c0   :  { %724 = vst [vmem:[%s1671_s11] sm:$0x3] %v721_v54 }

</bundles_post_ra>
